<compile_context>
chip_gen: v7x
topology: tpu7x:2x2x1
jax: 0.10.0
libtpu: 0.0.40
codegen_flags: <defaults>
</compile_context>

<pallas_src>
import jax
import jax.numpy as jnp
from jax import lax
from jax.experimental import pallas as pl
from jax.experimental.pallas import tpu as pltpu

_LN_EPS = 1e-5


def _context_block_kernel(x_ref, pc_ref, pp_ref, o_ref):
    # x_ref / o_ref: (C, HW)   pc_ref: (C, 2+2P)   pp_ref: (1, 1+3P)
    C, HW = x_ref.shape
    planes = (pc_ref.shape[1] - 2) // 2

    x = x_ref[...]                                        # (C, HW)

    # ---- unpack packed parameters (static slices of small VMEM tiles) ----
    wm    = pc_ref[:, 0:1]                                # (C, 1)   conv_mask weight
    w1t   = pc_ref[:, 1:1 + planes]                       # (C, P)   W1^T
    w2    = pc_ref[:, 1 + planes:1 + 2 * planes]          # (C, P)   W2
    b2    = pc_ref[:, 1 + 2 * planes:2 + 2 * planes]      # (C, 1)
    bm    = pp_ref[:, 0:1]                                # (1, 1)   conv_mask bias
    b1    = pp_ref[:, 1:1 + planes]                       # (1, P)
    gamma = pp_ref[:, 1 + planes:1 + 2 * planes]          # (1, P)
    beta  = pp_ref[:, 1 + 2 * planes:1 + 3 * planes]      # (1, P)

    # ---- spatial_pool (pooling_type='att') --------------------------------
    # 1x1 conv C->1, softmax over H*W, attention-weighted sum -> context (C,1)
    logits = jnp.sum(wm * x, axis=0, keepdims=True) + bm  # (1, HW)
    lmax = jnp.max(logits, axis=1, keepdims=True)
    e = jnp.exp(logits - lmax)
    attn = e / jnp.sum(e, axis=1, keepdims=True)          # (1, HW)
    context = jnp.sum(x * attn, axis=1, keepdims=True)    # (C, 1)

    # ---- channel_mul_conv: 1x1 conv -> LayerNorm([P,1,1]) -> ReLU -> 1x1 conv
    t = jnp.sum(w1t * context, axis=0, keepdims=True) + b1   # (1, P)
    mu = jnp.mean(t, axis=1, keepdims=True)
    var = jnp.mean((t - mu) * (t - mu), axis=1, keepdims=True)
    tn = (t - mu) * lax.rsqrt(var + _LN_EPS)
    tn = gamma * tn + beta
    tn = jnp.maximum(tn, 0.0)                                 # ReLU
    u = jnp.sum(w2 * tn, axis=1, keepdims=True) + b2          # (C, 1)
    s = 1.0 / (1.0 + jnp.exp(-u))                             # sigmoid, (C, 1)

    # ---- channel_mul fusion: out = x + x * s -------------------------------
    o_ref[...] = x * (1.0 + s)


def context_block_pallas(x, kparams):
    B, C, H, W = x.shape
    HW = H * W
    xf = x.reshape(B, C, HW)                 # lane-dense view (HW multiple of 128)
    pc, pp = kparams["pc"], kparams["pp"]

    x_spec = pl.BlockSpec((None, C, HW), lambda b: (b, 0, 0))
    pc_spec = pl.BlockSpec(pc.shape, lambda b: (0, 0))
    pp_spec = pl.BlockSpec(pp.shape, lambda b: (0, 0))

    # Explicit VMEM budget: double-buffered input + output blocks + params.
    block_bytes = C * HW * 4
    vmem_limit = max(4 * 1024 * 1024, 8 * block_bytes + 2 * 1024 * 1024)

    fn = pl.pallas_call(
        _context_block_kernel,
        out_shape=jax.ShapeDtypeStruct((B, C, HW), jnp.float32),
        grid=(B,),
        in_specs=[x_spec, pc_spec, pp_spec],
        out_specs=x_spec,
        compiler_params=pltpu.CompilerParams(
            dimension_semantics=("parallel",),
            vmem_limit_bytes=vmem_limit,
        ),
    )
    return fn(xf, pc, pp).reshape(B, C, H, W)


# ---------------------- parameter setup (deterministic) ----------------------
def init_params(key, C, planes):
    """Shapes follow the PyTorch __init__.  NOTE: the module's
    reset_parameters (when mmengine is available) zero-inits the last conv of
    channel_mul_conv, which makes channel_mul_term == sigmoid(0) == 0.5 and the
    output trivially 1.5*x; we use small random weights instead so the whole
    path is exercised non-trivially."""
    keys = jax.random.split(key, 8)
    sC = 1.0 / jnp.sqrt(jnp.float32(C))
    sP = 1.0 / jnp.sqrt(jnp.float32(planes))
    return {
        "w_mask": sC * jax.random.normal(keys[0], (1, C, 1, 1), jnp.float32),
        "b_mask": 0.1 * jax.random.normal(keys[1], (1,), jnp.float32),
        "w1": sC * jax.random.normal(keys[2], (planes, C, 1, 1), jnp.float32),
        "b1": 0.1 * jax.random.normal(keys[3], (planes,), jnp.float32),
        "gamma": 1.0 + 0.1 * jax.random.normal(keys[4], (planes, 1, 1), jnp.float32),
        "beta": 0.1 * jax.random.normal(keys[5], (planes, 1, 1), jnp.float32),
        "w2": sP * jax.random.normal(keys[6], (C, planes, 1, 1), jnp.float32),
        "b2": 0.1 * jax.random.normal(keys[7], (C,), jnp.float32),
    }


def to_kernel_params(p):
    """Pack the 8 small parameters into two lane-dense arrays."""
    C = p["w_mask"].shape[1]
    planes = p["w1"].shape[0]
    wm_col = p["w_mask"].reshape(C, 1)                  # (C, 1)
    w1t = p["w1"].reshape(planes, C).T                  # (C, P)
    w2 = p["w2"].reshape(C, planes)                     # (C, P)
    b2 = p["b2"].reshape(C, 1)                          # (C, 1)
    pc = jnp.concatenate([wm_col, w1t, w2, b2], axis=1)          # (C, 2+2P)
    pp = jnp.concatenate([p["b_mask"].reshape(1, 1),
                          p["b1"].reshape(1, planes),
                          p["gamma"].reshape(1, planes),
                          p["beta"].reshape(1, planes)], axis=1)  # (1, 1+3P)
    return {"pc": pc, "pp": pp}


# ------------------------- pure-JAX reference check --------------------------
def context_block_reference(x, p):
    B, C, H, W = x.shape
    HW = H * W
    xf = x.reshape(B, C, HW)
    wm = p["w_mask"].reshape(C)
    logits = jnp.einsum("bcl,c->bl", xf, wm) + p["b_mask"][0]     # (B, HW)
    attn = jax.nn.softmax(logits, axis=-1)
    ctx = jnp.einsum("bcl,bl->bc", xf, attn)                       # (B, C)
    w1 = p["w1"].reshape(-1, C)
    t = ctx @ w1.T + p["b1"]                                       # (B, P)
    mu = jnp.mean(t, axis=-1, keepdims=True)
    var = jnp.mean((t - mu) ** 2, axis=-1, keepdims=True)
    tn = (t - mu) / jnp.sqrt(var + _LN_EPS)
    tn = tn * p["gamma"].reshape(-1) + p["beta"].reshape(-1)
    tn = jnp.maximum(tn, 0.0)
    w2 = p["w2"].reshape(C, -1)
    u = tn @ w2.T + p["b2"]                                        # (B, C)
    s = jax.nn.sigmoid(u)
    return x + x * s[:, :, None, None]


if __name__ == "__main__":
    key = jax.random.PRNGKey(0)
    kx, kp = jax.random.split(key)
    B, C, H, W = 2, 4, 16, 16
    ratio = 0.5
    planes = int(C * ratio)   # 2 (inplanes * ratio, as in the PyTorch module)

    x = jax.random.normal(kx, (B, C, H, W), jnp.float32)
    params = init_params(kp, C, planes)
    kparams = to_kernel_params(params)

    out = jax.block_until_ready(context_block_pallas(x, kparams))

    ref = context_block_reference(x, params)
    err = float(jnp.max(jnp.abs(out - ref)))
    assert err < 1e-3, f"mismatch vs reference: {err}"
    # TODO(synk): only the default ContextBlock config (pooling_type='att',
    # fusion_types=('channel_mul',)) is implemented; 'avg' pooling and the
    # 'channel_add' branch are straightforward variants left out.
    print("KERNEL_OK")
</pallas_src>

<mosaic_0001>
module attributes {stable_mosaic.version = 11 : i64} {
  func.func @_context_block_kernel(%arg0: i32, %arg1: memref<1x4x256xf32, #tpu.memory_space<vmem>>, %arg2: memref<4x6xf32, #tpu.memory_space<vmem>>, %arg3: memref<1x7xf32, #tpu.memory_space<vmem>>, %arg4: memref<1x4x256xf32, #tpu.memory_space<vmem>>) attributes {dimension_semantics = [#tpu.dimension_semantics<parallel>], iteration_bounds = array<i64: 2>, scalar_prefetch = 0 : i64, scratch_operands = 0 : i64, tpu.core_type = #tpu.core_type<tc>, window_params = [{transform_indices = @transform_0, window_bounds = array<i64: 1, 4, 256>}, {pipeline_mode = #tpu.pipeline_mode<synchronous>, transform_indices = @transform_1, window_bounds = array<i64: 4, 6>}, {pipeline_mode = #tpu.pipeline_mode<synchronous>, transform_indices = @transform_2, window_bounds = array<i64: 1, 7>}, {transform_indices = @transform_3, window_bounds = array<i64: 1, 4, 256>}]} {
    %c0 = arith.constant 0 : index
    %c0_0 = arith.constant 0 : index
    %c0_1 = arith.constant 0 : index
    %0 = vector.load %arg1[%c0, %c0_0, %c0_1] : memref<1x4x256xf32, #tpu.memory_space<vmem>>, vector<1x4x256xf32>
    %1 = vector.shape_cast %0 : vector<1x4x256xf32> to vector<4x256xf32>
    %c0_2 = arith.constant 0 : index
    %c0_3 = arith.constant 0 : index
    %2 = vector.load %arg2[%c0_2, %c0_3] : memref<4x6xf32, #tpu.memory_space<vmem>>, vector<4x1xf32>
    %c0_4 = arith.constant 0 : index
    %c1 = arith.constant 1 : index
    %3 = vector.load %arg2[%c0_4, %c1] : memref<4x6xf32, #tpu.memory_space<vmem>>, vector<4x2xf32>
    %c0_5 = arith.constant 0 : index
    %c3 = arith.constant 3 : index
    %4 = vector.load %arg2[%c0_5, %c3] : memref<4x6xf32, #tpu.memory_space<vmem>>, vector<4x2xf32>
    %c0_6 = arith.constant 0 : index
    %c5 = arith.constant 5 : index
    %5 = vector.load %arg2[%c0_6, %c5] : memref<4x6xf32, #tpu.memory_space<vmem>>, vector<4x1xf32>
    %c0_7 = arith.constant 0 : index
    %c0_8 = arith.constant 0 : index
    %6 = vector.load %arg3[%c0_7, %c0_8] : memref<1x7xf32, #tpu.memory_space<vmem>>, vector<1x1xf32>
    %c0_9 = arith.constant 0 : index
    %c1_10 = arith.constant 1 : index
    %7 = vector.load %arg3[%c0_9, %c1_10] : memref<1x7xf32, #tpu.memory_space<vmem>>, vector<1x2xf32>
    %c0_11 = arith.constant 0 : index
    %c3_12 = arith.constant 3 : index
    %8 = vector.load %arg3[%c0_11, %c3_12] : memref<1x7xf32, #tpu.memory_space<vmem>>, vector<1x2xf32>
    %c0_13 = arith.constant 0 : index
    %c5_14 = arith.constant 5 : index
    %9 = vector.load %arg3[%c0_13, %c5_14] : memref<1x7xf32, #tpu.memory_space<vmem>>, vector<1x2xf32>
    %10 = vector.broadcast %2 : vector<4x1xf32> to vector<4x256xf32>
    %11 = arith.mulf %10, %1 : vector<4x256xf32>
    %cst = arith.constant dense<0.000000e+00> : vector<256xf32>
    %12 = vector.multi_reduction <add>, %11, %cst [0] : vector<4x256xf32> to vector<256xf32>
    %13 = vector.shape_cast %12 : vector<256xf32> to vector<1x256xf32>
    %14 = vector.broadcast %6 : vector<1x1xf32> to vector<1x256xf32>
    %15 = arith.addf %13, %14 : vector<1x256xf32>
    %cst_15 = arith.constant dense<0xFF800000> : vector<1xf32>
    %16 = vector.multi_reduction <maximumf>, %15, %cst_15 [1] : vector<1x256xf32> to vector<1xf32>
    %17 = vector.shape_cast %16 : vector<1xf32> to vector<1x1xf32>
    %18 = vector.broadcast %17 : vector<1x1xf32> to vector<1x256xf32>
    %19 = arith.subf %15, %18 : vector<1x256xf32>
    %20 = math.exp %19 : vector<1x256xf32>
    %cst_16 = arith.constant dense<0.000000e+00> : vector<1xf32>
    %21 = vector.multi_reduction <add>, %20, %cst_16 [1] : vector<1x256xf32> to vector<1xf32>
    %22 = vector.shape_cast %21 : vector<1xf32> to vector<1x1xf32>
    %23 = vector.broadcast %22 : vector<1x1xf32> to vector<1x256xf32>
    %24 = arith.divf %20, %23 : vector<1x256xf32>
    %25 = vector.broadcast %24 : vector<1x256xf32> to vector<4x256xf32>
    %26 = arith.mulf %1, %25 : vector<4x256xf32>
    %cst_17 = arith.constant dense<0.000000e+00> : vector<4xf32>
    %27 = vector.multi_reduction <add>, %26, %cst_17 [1] : vector<4x256xf32> to vector<4xf32>
    %28 = vector.shape_cast %27 : vector<4xf32> to vector<4x1xf32>
    %29 = vector.broadcast %28 : vector<4x1xf32> to vector<4x2xf32>
    %30 = arith.mulf %3, %29 : vector<4x2xf32>
    %cst_18 = arith.constant dense<0.000000e+00> : vector<2xf32>
    %31 = vector.multi_reduction <add>, %30, %cst_18 [0] : vector<4x2xf32> to vector<2xf32>
    %32 = vector.shape_cast %31 : vector<2xf32> to vector<1x2xf32>
    %33 = arith.addf %32, %7 : vector<1x2xf32>
    %cst_19 = arith.constant dense<0.000000e+00> : vector<1xf32>
    %34 = vector.multi_reduction <add>, %33, %cst_19 [1] : vector<1x2xf32> to vector<1xf32>
    %35 = vector.shape_cast %34 : vector<1xf32> to vector<1x1xf32>
    %cst_20 = arith.constant 2.000000e+00 : f32
    %36 = vector.broadcast %cst_20 : f32 to vector<1x1xf32>
    %37 = arith.divf %35, %36 : vector<1x1xf32>
    %38 = vector.broadcast %37 : vector<1x1xf32> to vector<1x2xf32>
    %39 = arith.subf %33, %38 : vector<1x2xf32>
    %40 = vector.broadcast %37 : vector<1x1xf32> to vector<1x2xf32>
    %41 = arith.subf %33, %40 : vector<1x2xf32>
    %42 = arith.mulf %39, %41 : vector<1x2xf32>
    %cst_21 = arith.constant dense<0.000000e+00> : vector<1xf32>
    %43 = vector.multi_reduction <add>, %42, %cst_21 [1] : vector<1x2xf32> to vector<1xf32>
    %44 = vector.shape_cast %43 : vector<1xf32> to vector<1x1xf32>
    %cst_22 = arith.constant 2.000000e+00 : f32
    %45 = vector.broadcast %cst_22 : f32 to vector<1x1xf32>
    %46 = arith.divf %44, %45 : vector<1x1xf32>
    %47 = vector.broadcast %37 : vector<1x1xf32> to vector<1x2xf32>
    %48 = arith.subf %33, %47 : vector<1x2xf32>
    %cst_23 = arith.constant 9.99999974E-6 : f32
    %49 = vector.broadcast %cst_23 : f32 to vector<1x1xf32>
    %50 = arith.addf %46, %49 : vector<1x1xf32>
    %51 = math.rsqrt %50 : vector<1x1xf32>
    %52 = vector.broadcast %51 : vector<1x1xf32> to vector<1x2xf32>
    %53 = arith.mulf %48, %52 : vector<1x2xf32>
    %54 = arith.mulf %8, %53 : vector<1x2xf32>
    %55 = arith.addf %54, %9 : vector<1x2xf32>
    %cst_24 = arith.constant 0.000000e+00 : f32
    %56 = vector.broadcast %cst_24 : f32 to vector<1x2xf32>
    %57 = arith.maximumf %55, %56 : vector<1x2xf32>
    %58 = vector.broadcast %57 : vector<1x2xf32> to vector<4x2xf32>
    %59 = arith.mulf %4, %58 : vector<4x2xf32>
    %cst_25 = arith.constant dense<0.000000e+00> : vector<4xf32>
    %60 = vector.multi_reduction <add>, %59, %cst_25 [1] : vector<4x2xf32> to vector<4xf32>
    %61 = vector.shape_cast %60 : vector<4xf32> to vector<4x1xf32>
    %62 = arith.addf %61, %5 : vector<4x1xf32>
    %cst_26 = arith.constant 0.000000e+00 : f32
    %63 = vector.broadcast %cst_26 : f32 to vector<4x1xf32>
    %64 = arith.subf %63, %62 : vector<4x1xf32>
    %65 = math.exp %64 : vector<4x1xf32>
    %cst_27 = arith.constant 1.000000e+00 : f32
    %66 = vector.broadcast %cst_27 : f32 to vector<4x1xf32>
    %67 = arith.addf %66, %65 : vector<4x1xf32>
    %cst_28 = arith.constant 1.000000e+00 : f32
    %68 = vector.broadcast %cst_28 : f32 to vector<4x1xf32>
    %69 = arith.divf %68, %67 : vector<4x1xf32>
    %cst_29 = arith.constant 1.000000e+00 : f32
    %70 = vector.broadcast %cst_29 : f32 to vector<4x1xf32>
    %71 = arith.addf %70, %69 : vector<4x1xf32>
    %72 = vector.broadcast %71 : vector<4x1xf32> to vector<4x256xf32>
    %73 = arith.mulf %1, %72 : vector<4x256xf32>
    %c0_30 = arith.constant 0 : index
    %c0_31 = arith.constant 0 : index
    %c0_32 = arith.constant 0 : index
    %74 = vector.load %arg4[%c0_30, %c0_31, %c0_32] : memref<1x4x256xf32, #tpu.memory_space<vmem>>, vector<1x4x256xf32>
    %75 = vector.shape_cast %74 : vector<1x4x256xf32> to vector<4x256xf32>
    %76 = vector.shape_cast %73 : vector<4x256xf32> to vector<1x4x256xf32>
    tpu.vector_store %arg4[%c0_30, %c0_31, %c0_32], %76 {strides = array<i32>} : memref<1x4x256xf32, #tpu.memory_space<vmem>>, vector<1x4x256xf32>,
    return
  }
  func.func @transform_0(%arg0: i32) -> (i32, i32, i32) {
    %c0_i32 = arith.constant 0 : i32
    %c0_i32_0 = arith.constant 0 : i32
    %c0_i32_1 = arith.constant 0 : i32
    return %arg0, %c0_i32, %c0_i32_0 : i32, i32, i32
  }
  func.func @transform_1(%arg0: i32) -> (i32, i32) {
    %c0_i32 = arith.constant 0 : i32
    %c0_i32_0 = arith.constant 0 : i32
    %c0_i32_1 = arith.constant 0 : i32
    return %c0_i32, %c0_i32_0 : i32, i32
  }
  func.func @transform_2(%arg0: i32) -> (i32, i32) {
    %c0_i32 = arith.constant 0 : i32
    %c0_i32_0 = arith.constant 0 : i32
    %c0_i32_1 = arith.constant 0 : i32
    return %c0_i32, %c0_i32_0 : i32, i32
  }
  func.func @transform_3(%arg0: i32) -> (i32, i32, i32) {
    %c0_i32 = arith.constant 0 : i32
    %c0_i32_0 = arith.constant 0 : i32
    %c0_i32_1 = arith.constant 0 : i32
    return %arg0, %c0_i32, %c0_i32_0 : i32, i32, i32
  }
}

</mosaic_0001>

<bundles_post_ra>
// kernel: tpu_custom_call.1
= control target key start
LH: loop header
LB: loop body
LE: loop exit
PB: predicated region body
PF: predicated region fallthrough
CT: control target
= control target key end

     0   :  { %8 = vsyncpa [#allocation3], 0  ;;  %s955_s0 = inlined_call_operand.hbm [shape: f32[2,4,256], index: 0, kind: input, shape index: {}]   ;;  %s956_s1 = inlined_call_operand.hbm [shape: f32[4,6], index: 1, kind: input, shape index: {}]   ;;  %s957_s2 = inlined_call_operand.vmem [shape: f32[1,7], index: 2, kind: input, shape index: {}]   ;;  %s958_s3 = inlined_call_operand.hbm [shape: f32[2,4,256], index: 3, kind: output, shape index: {}]  }
   0x1   :  { %10 = vsyncpa [#allocation3 + $0x1], 0 }
   0x2   :  { %11 = vsyncpa [#allocation6], 0 }
   0x3   :  { %12 = vsyncpa [#allocation4], 0 }
   0x4   :  { %14 = vsyncpa [#allocation4 + $0x1], 0  ;;  %s715_s12 = smov 0   ;;  %s717_s13 = smov 0  }
   0x5   :  { %s719_s14 = smov 0   ;;  %s721_s15 = smov 0  }
   0x6 LB: > { %s736_s16 = sadd.s32 4294967295, %s682_s15   ;;  %s456_s17 = sadd.s32 4294967294, %s682_s15   ;;  %s682_s15 = sphi %s721_s15, %s982_s15   ;;  %s678_s14 = sphi %s719_s14, %s981_s14   ;;  %s674_s13 = sphi %s717_s13, %s980_s13   ;;  %s670_s12 = sphi %s715_s12, %s979_s12  }
   0x7   : > { %p40_p0 = scmp.ne.s32.totalorder %s674_s13, %s670_s12  ;;  %p959_p1 = scmp.eq.s32.totalorder %s736_s16, 0 }
   0x8   : > { %p112_p3 = scmp.eq.s32.totalorder %s456_s17, 1  ;;  %p457_p5 = scmp.ge.s32.totalorder %s682_s15, 1 }
   0x9   : > { %p745_p4 = por %p959_p1, %p40_p0  ;;  %p119_p7 = scmp.lt.s32.totalorder %s682_s15, 3 }
   0xa   : > { %p750_p6 = por %p112_p3, %p40_p0  ;;  %s684_s21 = smov [#allocation5]  }
   0xb   : > { %s962_s18 = scalar_select %p745_p4, 1, 0 }
   0xc   : > { %s963_s19 = scalar_select %p750_p6, 1, 0 }
   0xd   : > { %p755_p8 = pnand %p457_p5, %p119_p7  ;;  %s132_s22 = sshll.u32 %s684_s21, 4  ;;  %s133_s22 = int_to_ptr.vmem [resolvable:$true] %s132_s22 }
   0xe   : > { %s763_s23 = sadd.s32 1, %s682_s15   ;;  %s27_s27 = sadd.s32 1, %s678_s14 }
   0xf   : > { %s964_s20 = scalar_select %p755_p8, 1, 0 }
  0x10   : > { %p482_p10 = pneg %p755_p8  ;;  %s24_s25 = ssub.s32 %s682_s15, %s763_s23 }
  0x11   : > { %p773_p12 = scmp.eq.s32.totalorder %s24_s25, 0  ;;  %s554_s30 = scalar_lea.hbm %s956_s1, 64 }
  0x12   : > { %p767_p11 = pnand %p482_p10, %p959_p1  ;;  %p555_p0 = scmp.ne.s32.totalorder %s956_s1, %s554_s30 }
  0x13   : > { %s966_s26 = scalar_select %p773_p12, 1, 0 }
  0x14   : > { %p556_p3 = pneg %p767_p11  ;;  %p561_p10 = scmp.lt.u32.totalorder %s554_s30, %s956_s1 }
  0x16   : > { %p557_p5 = pnand %p556_p3, %p555_p0 }
  0x18   : > { %p558_p7 = pneg %p557_p5 }
  0x1a   : > { %p563_p9 = pnand %p561_p10, %p558_p7 }
  0x1c   : > { %566 = shalt.err (!%p563_p9)
}
  0x1d   : > { %s567_s8 = scalar_lea.vmem %s133_s22, 64  ;;  %p575_p6 = scmp.lt.s32.totalorder %s133_s22, %s133_s22 }
  0x1e   : > { %p568_p1 = scmp.ne.s32.totalorder %s133_s22, %s567_s8  ;;  %p576_p4 = scmp.lt.s32.totalorder %s567_s8, %s567_s8 }
  0x20   : > { %p570_p2 = pnand %p568_p1, %p556_p3  ;;  %p577_p8 = por %p576_p4, %p575_p6 }
  0x22   : > { %p571_p13 = pneg %p570_p2 }
  0x24   : > { %p578_p12 = pnand %p577_p8, %p571_p13 }
  0x26   : > { %581 = shalt.err (!%p578_p12)
}
  0x27   : > { %485 = dma.hbm_to_vmem [thread:$0]  (!%p767_p11), %s956_s1, 64, %s133_s22, [#allocation6]  }
  0x28   : > { %p967_p1 = scmp.ne.s32.totalorder %s966_s26, 0  ;;  %p35_p2 = scmp.eq.s32.totalorder %s682_s15, 0 }
  0x29   : > { %p968_p4 = scmp.ne.s32.totalorder %s678_s14, %s674_s13  ;;  %p969_p6 = scmp.eq.s32.totalorder %s736_s16, 1 }
  0x2a   : > { %s799_s11 = scalar_select %p967_p1, %s678_s14, %s27_s27  }
  0x2b   : > { %p807_p8 = por %p969_p6, %p968_p4  ;;  %p495_p9 = scmp.lt.s32.totalorder %s682_s15, 2 }
  0x2c   : > { %s146_s21 = sand.u32 1, %s678_s14   ;;  %p971_p12 = pmov %p968_p4 }
  0x2d   : > { %s460_s24 = sshll.u32 %s146_s21, 3  ;;  %s472_s25 = sshll.u32 %s682_s15, 7 }
  0x2e   : > { %p36_p13 = por %p35_p2, %p971_p12  ;;  %s820_s22 = scalar_lea.hbm %s955_s0, %s472_s25 }
  0x2f   : > { %s150_s26 = scalar_lea.vmem [#allocation2], %s460_s24  ;;  %s147_s4 = scalar_lea.sflag [#allocation3], %s146_s21 }
  0x30   : > { %s158_s27 = sshll.u32 %s150_s26, 4  ;;  %p822_p11 = pnand %p495_p9, %p36_p13  ;;  %s826_s27 = int_to_ptr.vmem [resolvable:$true] %s158_s27 }
  0x31   : > { %s582_s5 = scalar_lea.hbm %s820_s22, 128  ;;  %s587_s8 = scalar_lea.hbm %s955_s0, 256 }
  0x32   : > { %p583_p0 = scmp.ne.s32.totalorder %s820_s22, %s582_s5  ;;  %p584_p3 = pneg %p822_p11 }
  0x33   : > { %p588_p10 = scmp.lt.u32.totalorder %s820_s22, %s955_s0  ;;  %p589_p1 = scmp.lt.u32.totalorder %s587_s8, %s582_s5 }
  0x34   : > { %p585_p5 = pnand %p584_p3, %p583_p0  ;;  %p591_p4 = scmp.lt.u32.totalorder %s582_s5, %s820_s22 }
  0x35   : > { %p590_p2 = por %p589_p1, %p588_p10 }
  0x36   : > { %p586_p7 = pneg %p585_p5 }
  0x37   : > { %p592_p6 = por %p591_p4, %p590_p2 }
  0x39   : > { %p593_p9 = pnand %p592_p6, %p586_p7 }
  0x3b   : > { %596 = shalt.err (!%p593_p9)
}
  0x3c   : > { %s597_s21 = scalar_lea.vmem %s826_s27, 128  ;;  %s685_s24 = smov [#allocation2]  }
  0x3d   : > { %p598_p12 = scmp.ne.s32.totalorder %s826_s27, %s597_s21  ;;  %s602_s25 = sshll.u32 %s685_s24, 4  ;;  %s603_s25 = int_to_ptr.vmem [resolvable:$false] %s602_s25 }
  0x3e   : > { %s604_s28 = scalar_lea.vmem %s603_s25, 256  ;;  %p605_p5 = scmp.lt.s32.totalorder %s826_s27, %s603_s25 }
  0x3f   : > { %p600_p13 = pnand %p598_p12, %p584_p3  ;;  %p606_p10 = scmp.lt.s32.totalorder %s604_s28, %s597_s21 }
  0x41   : > { %p601_p0 = pneg %p600_p13  ;;  %p607_p1 = por %p606_p10, %p605_p5 }
  0x43   : > { %p608_p2 = pnand %p607_p1, %p601_p0 }
  0x45   : > { %611 = shalt.err (!%p608_p2)
}
  0x46   : > { %489 = dma.hbm_to_vmem [thread:$0]  (!%p822_p11), %s820_s22, 128, %s826_s27, %s147_s4  }
  0x47   : > { %p973_p7 = scmp.ne.s32.totalorder %s964_s20, 0 }
  0x48   : > { %s856_s29 = sand.u32 (!%p973_p7), 1, %s674_s13   ;;  %p974_p3 = scmp.ne.s32.totalorder (!%p973_p7), %s962_s18, 0 }
  0x49   : > { %167 = sbr.rel (%p973_p7) target bundleno = 1822 (0x71e), region = 32  ;;  %s464_s26 = sshll.u32 (!%p973_p7), %s856_s29, 3 }
  0x4a   : > { %s170_s5 = scalar_lea.sflag (!%p973_p7), [#allocation3], %s856_s29  ;;  %s173_s6 = scalar_lea.vmem (!%p973_p7), [#allocation2], %s464_s26 }
  0x50   : > { %657 = dma.done.wait (%p974_p3), %s170_s5, 128  }
  0x51   : > { %659 = vsyncadd (%p974_p3), %s170_s5, 4294967168  ;;  %p975_p11 = scmp.eq.s32.totalorder %s736_s16, 0 }
  0x53   : > { %661 = dma.done.wait (%p975_p11), [#allocation6], 64   ;;  %p976_p4 = pmov %p975_p11 }
  0x54   : > { %v686_v0 = vmov 0   ;;  %v870_v1 = vld [vmem:[#allocation5] sm:$0xf]  ;;  %v876_v2 = vld [vmem:[%s957_s2] sm:$0x1]  ;;  %vm213_vm0 = vcmask 1043456   ;;  %v233_v8 = vlaneseq }
  0x55   : > { %663 = vsyncadd (%p976_p4), [#allocation6], 4294967232  ;;  %539 = vset.pattern.permute.xlu0 %v686_v0  ;;  %v879_v3 = vld [vmem:[%s173_s6] sm:$0xff]  ;;  %vm268_vm1 = vcmask 19464   ;;  %s687_s18 = smov 127   ;;  %vm281_vm2 = vcmask 8192  }
  0x56   : > { %205 = vperm.xlu0 %539, %v870_v1   ;;  %v209_v4 = vcombine.high %v879_v3, %v879_v3  ;;  %v886_v15 = vshrl.u32 %v233_v8, 7  ;;  %v688_v8 = vmov 1966171168   ;;  %s689_s27 = smov 2   ;;  %s690_s30 = smov 126   ;;  %vm335_vm3 = vcmask 11264  }
  0x57   : > { %s691_s4 = smov 125   ;;  %s473_s7 = sshll.u32 %s736_s16, 7 }
  0x58   : > { %v235_v18 = vsub.s32 0, %v886_v15  ;;  %s199_s8 = scalar_lea.vmem [#allocation7], %s464_s26  ;;  %s911_s24 = scalar_lea.hbm %s958_s3, %s473_s7 }
  0x59   : > { %s376_s9 = sshll.u32 %s199_s8, 4  ;;  %s362_s25 = scalar_lea.sflag [#allocation4], %s856_s29  ;;  %s913_s9 = int_to_ptr.vmem [resolvable:$true] %s376_s9 }
  0x5a   : > { %230 = vperm.xlu0 %539, %v876_v2   ;;  %s612_s28 = scalar_lea.vmem %s913_s9, 128  ;;  %s694_s16 = smov [#allocation7]  }
  0x5b   : > { %p613_p6 = scmp.ne.s32.totalorder %s913_s9, %s612_s28  ;;  %s616_s26 = sshll.u32 %s694_s16, 4  ;;  %s617_s26 = int_to_ptr.vmem [resolvable:$false] %s616_s26 }
  0x5c   : > { %s618_s5 = scalar_lea.vmem %s617_s26, 256  ;;  %p619_p13 = scmp.lt.s32.totalorder %s913_s9, %s617_s26 }
  0x5d   : > { %p614_p9 = pnand %p613_p6, %p807_p8  ;;  %p620_p0 = scmp.lt.s32.totalorder %s618_s5, %s612_s28 }
  0x5f   : > { %p615_p12 = pneg %p614_p9  ;;  %p621_p5 = por %p620_p0, %p619_p13 }
  0x61   : > { %p622_p10 = pnand %p621_p5, %p615_p12 }
  0xd5   : > { %v206_v5 = vpop.permute.xlu0 %205 }
  0xd6   : > { %v211_v6 = vmul.f32 %v206_v5, %v879_v3  ;;  %v212_v7 = vmul.f32 %v209_v4, %v206_v5 }
  0xd8   : > { %v214_v9 = vsel %vm213_vm0, %v211_v6, 0.0  ;;  %v221_v10 = vsel %vm213_vm0, %v212_v7, 0.0 }
  0xd9   : > { %v215_v11 = vrot.slane %v214_v9, 4  ;;  %v222_v12 = vrot.slane %v221_v10, 4  ;;  %v231_v21 = vpop.permute.xlu0 %230 }
  0xda   : > { %v236_v24 = vrot.slane %v231_v21, %v235_v18 }
  0xdb   : > { %v216_v13 = vadd.f32 %v215_v11, %v214_v9  ;;  %v223_v14 = vadd.f32 %v222_v12, %v221_v10  ;;  %v302_v9 = vunpack.c.l.s4 %v688_v8 }
  0xdd   : > { %v217_v16 = vrot.slane %v216_v13, 2  ;;  %v224_v17 = vrot.slane %v223_v14, 2  ;;  %v303_v10 = vunpack.c.0.s8 %v302_v9 }
  0xdf   : > { %v218_v19 = vadd.f32 %v217_v16, %v216_v13  ;;  %v225_v20 = vadd.f32 %v224_v17, %v223_v14  ;;  %v306_v11 = vsub.s32 %v303_v10, %v886_v15 }
  0xe1   : > { %v219_v22 = vrot.slane %v218_v19, 1  ;;  %v226_v23 = vrot.slane %v225_v20, 1 }
  0xe3   : > { %v220_v25 = vadd.f32 %v219_v22, %v218_v19  ;;  %v227_v26 = vadd.f32 %v226_v23, %v225_v20 }
  0xe5   : > { %v237_v27 = vadd.f32 %v236_v24, %v220_v25  ;;  %v238_v28 = vadd.f32 %v236_v24, %v227_v26 }
  0xe7   : > { %v239_v29 = vmax.f32 %v237_v27, %v238_v28 }
  0xe9   : > { %240 = vmax.xlane.f32.xlu1 %v239_v29 }
 0x176   : > { %v241_v30 = vpop.xlane.xlu1 %240 }
 0x177   : > { %v242_v31 = vsub.f32 %v237_v27, %v241_v30  ;;  %v243_v32 = vsub.f32 %v238_v28, %v241_v30  ;;  %v692_v27 = vmov 5  }
 0x178   : > { %540 = vset.pattern.permute.xlu0 %v692_v27 }
 0x179   : > { %v244_v33 = vmul.f32 1.442695, %v242_v31  ;;  %v246_v34 = vmul.f32 1.442695, %v243_v32 }
 0x17b   : > { %542 = vpow2.f32 %v244_v33 }
 0x17c   : > { %544 = vpow2.f32 %v246_v34  ;;  %v693_v34 = vmov 839922192  }
 0x185   : > { %v543_v35 = vpop.eup %542 }
 0x186   : > { %v545_v36 = vpop.eup %544 }
 0x187   : > { %v248_v37 = vadd.f32 %v545_v36, %v543_v35 }
 0x189   : > { %249 = vadd.xlane.f32.xlu1 %v248_v37 }
 0x216   : > { %v250_v38 = vpop.xlane.xlu1 %249 }
 0x217   : > { %546 = vrcp.f32 %v250_v38 }
 0x221   : > { %v547_v39 = vpop.eup %546 }
 0x222   : > { %v252_v40 = vmul.f32 %v547_v39, %v543_v35  ;;  %v253_v41 = vmul.f32 %v547_v39, %v545_v36  ;;  %v352_v35 = vunpack.c.l.s4 %v693_v34 }
 0x224   : > { %v256_v42 = vcombine.low %v252_v40, %v253_v41  ;;  %v353_v36 = vunpack.c.0.s8 %v352_v35 }
 0x226   : > { %v258_v43 = vmul.f32 %v256_v42, %v879_v3  ;;  %v356_v37 = vsub.s32 %v353_v36, %v886_v15 }
 0x228   : > { %v260_v44 = vcombine.high %v258_v43, %v258_v43  ;;  %v262_v45 = vsel %vm213_vm0, %v258_v43, 0.0 }
 0x22a   : > { %v263_v46 = vsel %vm213_vm0, %v260_v44, 0.0 }
 0x22b   : > { %v264_v47 = vadd.f32 %v263_v46, %v262_v45 }
 0x22d   : > { %265 = vadd.xlane.f32.xlu0 %v264_v47 }
 0x2ba   : > { %v266_v48 = vpop.xlane.xlu0 %265 }
 0x2bb   : > { %v267_v49 = vmul.f32 %v266_v48, %v870_v1 }
 0x2bd   : > { %v269_v50 = vsel %vm268_vm1, %v267_v49, 0.0 }
 0x2be   : > { %v270_v51 = vrot.slane %v269_v50, 4 }
 0x2c0   : > { %v271_v52 = vadd.f32 %v270_v51, %v269_v50 }
 0x2c2   : > { %v272_v53 = vrot.slane %v271_v52, 2 }
 0x2c4   : > { %v273_v54 = vadd.f32 %v272_v53, %v271_v52 }
 0x2c6   : > { %v274_v55 = vrot.slane %v273_v54, 1 }
 0x2c8   : > { %v275_v56 = vadd.f32 %v274_v55, %v273_v54 }
 0x2ca   : > { %v276_v57 = vadd.f32 %v275_v56, %v876_v2 }
 0x2cc   : > { %278 = vrot.lane.b32.xlu1 %v276_v57, %s687_s18 }
 0x33e   : > { %v279_v58 = vpop.permute.xlu1 %278 }
 0x33f   : > { %v282_v59 = vsel %vm281_vm2, %v279_v58, 0.0 }
 0x340   : > { %283 = vadd.xlane.f32.xlu1 %v282_v59 }
 0x3cd   : > { %v284_v60 = vpop.xlane.xlu1 %283 }
 0x3ce   : > { %v286_v61 = vmul.f32 0.5, %v284_v60 }
 0x3d0   : > { %v287_v62 = vsub.f32 %v276_v57, %v286_v61 }
 0x3d2   : > { %v288_v63 = vmul.f32 %v287_v62, %v287_v62 }
 0x3d4   : > { %290 = vrot.lane.b32.xlu0 %v288_v63, %s687_s18 }
 0x446   : > { %v291_v0 = vpop.permute.xlu0 %290 }
 0x447   : > { %v293_v4 = vsel %vm281_vm2, %v291_v0, 0.0 }
 0x448   : > { %294 = vadd.xlane.f32.xlu0 %v293_v4 }
 0x4d5   : > { %v295_v5 = vpop.xlane.xlu0 %294 }
 0x4d6   : > { %v296_v6 = vmul.f32 0.5, %v295_v5 }
 0x4d8   : > { %v297_v7 = vadd.f32 1e-05, %v296_v6 }
 0x4da   : > { %548 = vrsqrt.f32 %v297_v7 }
 0x4e4   : > { %v549_v12 = vpop.eup %548 }
 0x4e5   : > { %v299_v13 = vmul.f32 %v549_v12, %v287_v62 }
 0x4e7   : > { %v307_v14 = vrot.slane %v299_v13, %v306_v11 }
 0x4e9   : > { %v314_v16 = vrot.slane %v307_v14, %v306_v11 }
 0x4eb   : > { %315 = vrot.lane.b32.xlu1 %v314_v16, %s689_s27 }
 0x4ef   : > { %319 = vrot.lane.b32.xlu1 %v876_v2, %s690_s30 }
 0x55d   : > { %v316_v17 = vpop.permute.xlu1 %315 }
 0x55e   : > { %v318_v19 = vmul.f32 %v316_v17, %v876_v2 }
 0x561   : > { %v320_v20 = vpop.permute.xlu1 %319 }
 0x562   : > { %v322_v21 = vadd.f32 %v320_v20, %v318_v19 }
 0x564   : > { %v323_v22 = vmax.f32 %v322_v21, 0.0 }
 0x566   : > { %v328_v23 = vrot.slane %v323_v22, %v235_v18 }
 0x568   : > { %v330_v24 = vmul.f32 %v328_v23, %v870_v1 }
 0x56a   : > { %332 = vrot.lane.b32.xlu1 %v330_v24, %s691_s4 }
 0x5dc   : > { %v333_v25 = vpop.permute.xlu1 %332 }
 0x5dd   : > { %v336_v26 = vsel %vm335_vm3, %v333_v25, 0.0 }
 0x5de   : > { %337 = vadd.xlane.f32.xlu1 %v336_v26 }
 0x66b   : > { %v338_v28 = vpop.xlane.xlu1 %337 }
 0x66c   : > { %v339_v2 = vadd.f32 %v338_v28, %v870_v1 }
 0x66e   : > { %v340_v29 = vsub.f32 0.0, %v339_v2 }
 0x670   : > { %v341_v30 = vmul.f32 1.442695, %v340_v29 }
 0x672   : > { %550 = vpow2.f32 %v341_v30 }
 0x67c   : > { %v551_v31 = vpop.eup %550 }
 0x67d   : > { %v343_v18 = vadd.f32 1.0, %v551_v31 }
 0x67f   : > { %552 = vrcp.f32 %v343_v18 }
 0x689   : > { %v553_v32 = vpop.eup %552 }
 0x68a   : > { %v346_v33 = vadd.f32 1.0, %v553_v32 }
 0x68c   : > { %349 = vperm.xlu0 %540, %v346_v33  }
 0x70b   : > { %v350_v38 = vpop.permute.xlu0 %349 }
 0x70c   : > { %v357_v1 = vrot.slane %v350_v38, %v356_v37 }
 0x70e   : > { %v359_v39 = vmul.f32 %v357_v1, %v879_v3 }
 0x710   : > { %360 = vst [vmem:[%s199_s8] sm:$0xff] %v359_v39 }
 0x711   : > { %625 = shalt.err (!%p622_p10)
}
 0x712   : > { %s626_s29 = scalar_lea.hbm %s911_s24, 128  ;;  %s630_s22 = scalar_lea.hbm %s958_s3, 256 }
 0x713   : > { %p627_p1 = scmp.ne.s32.totalorder %s911_s24, %s626_s29  ;;  %p631_p3 = scmp.lt.u32.totalorder %s911_s24, %s958_s3 }
 0x714   : > { %p632_p11 = scmp.lt.u32.totalorder %s630_s22, %s626_s29  ;;  %p634_p6 = scmp.lt.u32.totalorder %s626_s29, %s911_s24 }
 0x715   : > { %p628_p2 = pnand %p627_p1, %p807_p8 }
 0x716   : > { %p633_p4 = por %p632_p11, %p631_p3 }
 0x717   : > { %p629_p7 = pneg %p628_p2 }
 0x718   : > { %p635_p9 = por %p634_p6, %p633_p4 }
 0x71a   : > { %p636_p12 = pnand %p635_p9, %p629_p7 }
 0x71c   : > { %639 = shalt.err (!%p636_p12)
}
 0x71d   : > { %480 = dma.vmem_to_hbm [thread:$0]  (%p807_p8), %s913_s9, 128, %s911_s24, %s362_s25  }
 0x71e PF: > { %s388_s30 = sand.u32 1, %s670_s12   ;;  %p977_p13 = scmp.ne.s32.totalorder %s963_s19, 0 }
 0x71f   : > { %p978_p0 = scmp.ge.s32.totalorder %s682_s15, 2  ;;  %s389_s4 = scalar_lea.sflag [#allocation4], %s388_s30 }
 0x721   : > { %p491_p5 = pnand %p978_p0, %p977_p13 }
 0x723   : > { %665 = dma.done.wait (!%p491_p5), %s389_s4, 128  }
 0x724   : > { %667 = vsyncadd (!%p491_p5), %s389_s4, 4294967168  ;;  %p17_p10 = scmp.ge.s32.totalorder %s763_s23, 4   ;;  %s979_s12 = smov %s674_s13 }
 0x725   : > { %s980_s13 = smov %s678_s14  ;;  %s981_s14 = smov %s799_s11 }
 0x726   : > { %s982_s15 = smov %s763_s23  ;;  %19 = sbr.rel (!%p17_p10) target bundleno = 6 (0x6), region = 81 }
 0x72d   :  { %394 = vsyncpa [#allocation3], 1 }
 0x72e   :  { %396 = vsyncpa [#allocation3 + $0x1], 1 }
 0x72f   :  { %397 = vsyncpa [#allocation6], 1 }
 0x730   :  { %398 = vsyncpa [#allocation4], 1 }
 0x731   :  { %400 = vsyncpa [#allocation4 + $0x1], 1 }

</bundles_post_ra>
